<compile_context>
chip_gen: v6e
topology: v6e:2x2x1
jax: 0.10.0
libtpu: 0.0.40
codegen_flags: <defaults>
</compile_context>

<pallas_src>
from functools import partial

import jax
import jax.numpy as jnp
import numpy as np
from jax import lax
from jax.experimental import pallas as pl
from jax.experimental.pallas import tpu as pltpu


# ---------------------------------------------------------------------------
# Kernel
# ---------------------------------------------------------------------------
def _cola_kernel(*refs, add_bias, do_rms_norm):
    # refs = (x_ref, a_ref, [b_ref], o_ref, acc_ref)
    if add_bias:
        x_ref, a_ref, b_ref, o_ref, acc_ref = refs
    else:
        x_ref, a_ref, o_ref, acc_ref = refs
        b_ref = None

    k = pl.program_id(2)

    @pl.when(k == 0)
    def _init():
        acc_ref[...] = jnp.zeros_like(acc_ref)

    acc_ref[...] += jnp.dot(
        x_ref[...], a_ref[...], preferred_element_type=jnp.float32
    )

    @pl.when(k == pl.num_programs(2) - 1)
    def _finalize():
        out = acc_ref[...]
        if add_bias:
            out = out + b_ref[...].astype(jnp.float32)
        if do_rms_norm:
            # out / max(rms, 1) == out * min(rsqrt(mean(out^2) + eps), 1)
            # (rsqrt hits the otherwise-idle EUP slot; divide becomes a mul)
            inv_rms = lax.rsqrt(
                jnp.mean(out * out, axis=-1, keepdims=True) + 1e-6
            )
            out = out * jnp.minimum(inv_rms, 1.0)
        o_ref[...] = out.astype(o_ref.dtype)


# ---------------------------------------------------------------------------
# Tiling helpers
# ---------------------------------------------------------------------------
def _round_up(x, m):
    return ((x + m - 1) // m) * m


def _pick_tile(dim, target, align):
    """Full dim if it is small; otherwise the largest `align`-multiple tile
    <= target that divides `dim` exactly; otherwise fall back to full dim."""
    if dim <= target:
        return dim
    t = (target // align) * align
    while t >= align:
        if dim % t == 0:
            return t
        t -= align
    return dim


def _vmem_estimate(tm, tk, tn, x_dt, a_dt, o_dt, add_bias, b_dt):
    bs = 2 * (tm * tk * jnp.dtype(x_dt).itemsize          # double-buffered x
              + tk * tn * jnp.dtype(a_dt).itemsize        # double-buffered A
              + tm * tn * jnp.dtype(o_dt).itemsize)       # double-buffered out
    bs += tm * tn * 4                                     # f32 accumulator
    if add_bias:
        bs += 2 * tn * jnp.dtype(b_dt).itemsize
    return bs


# ---------------------------------------------------------------------------
# Wrapper
# ---------------------------------------------------------------------------
def cola_layer_forward(x, A, b=None, *, do_rms_norm=False,
                       tile_m=512, tile_n=512, tile_k=512):
    """Pallas implementation of CoLALayer.forward (padding=False path)."""
    batch_shape = x.shape[:-1]
    d_in = x.shape[-1]
    d_out = A.shape[-1]
    x2 = x.reshape(-1, d_in)
    M = x2.shape[0]

    add_bias = b is not None

    # --- tile selection -----------------------------------------------------
    # Row tile: full M when small (exact, no ragged block); otherwise an
    # 8-aligned tile with a ragged (masked) final block — no jnp.pad copy.
    assert tile_m % 8 == 0
    tm = M if M <= tile_m else tile_m
    # K tile must divide d_in exactly (ragged K would pollute the accumulator).
    tk = _pick_tile(d_in, tile_k, 128)
    # N tile: full d_out when rms-norm needs the whole row, else 128-aligned.
    tn = d_out if (do_rms_norm or d_out <= tile_n) else _pick_tile(d_out, tile_n, 128)

    grid = (pl.cdiv(M, tm), pl.cdiv(d_out, tn), d_in // tk)

    # --- specs ----------------------------------------------------------------
    in_specs = [
        pl.BlockSpec((tm, tk), lambda i, j, k: (i, k)),    # x tile
        pl.BlockSpec((tk, tn), lambda i, j, k: (k, j)),    # A tile
    ]
    operands = [x2, A]
    if add_bias:
        in_specs.append(pl.BlockSpec((1, tn), lambda i, j, k: (0, j)))
        operands.append(b.reshape(1, d_out))

    est = _vmem_estimate(tm, tk, tn, x2.dtype, A.dtype, x.dtype,
                         add_bias, b.dtype if add_bias else None)
    vmem_limit = int(min(max(2 * est, 32 * 1024 * 1024), 64 * 1024 * 1024))

    kernel = partial(_cola_kernel, add_bias=add_bias, do_rms_norm=do_rms_norm)

    out = pl.pallas_call(
        kernel,
        out_shape=jax.ShapeDtypeStruct((M, d_out), x.dtype),
        grid_spec=pltpu.PrefetchScalarGridSpec(
            num_scalar_prefetch=0,
            grid=grid,
            in_specs=in_specs,
            out_specs=pl.BlockSpec((tm, tn), lambda i, j, k: (i, j)),
            scratch_shapes=[pltpu.VMEM((tm, tn), jnp.float32)],
        ),
        compiler_params=pltpu.CompilerParams(
            dimension_semantics=("parallel", "parallel", "arbitrary"),
            vmem_limit_bytes=vmem_limit,
        ),
    )(*operands)

    return out.reshape(*batch_shape, d_out)


# ---------------------------------------------------------------------------
# Pure-JAX reference
# ---------------------------------------------------------------------------
def cola_layer_reference(x, A, b=None, *, do_rms_norm=False):
    batch_shape = x.shape[:-1]
    x2 = x.reshape(-1, x.shape[-1])
    out = x2 @ A
    if b is not None:
        out = out + b
    if do_rms_norm:
        out_rms = jnp.sqrt(jnp.mean(out ** 2, axis=-1) + 1e-6)
        denom = jnp.maximum(out_rms, jnp.ones_like(out_rms))[:, None]
        out = out / denom
    return out.reshape(*batch_shape, -1)


# ---------------------------------------------------------------------------
# Demo / correctness checks
# ---------------------------------------------------------------------------
if __name__ == "__main__":
    key = jax.random.PRNGKey(0)
    kx, ka, kx2 = jax.random.split(key, 3)

    # Small shapes consistent with the module: batch=2, seq=8, hidden 32 -> 32.
    batch, seq, d_in, d_out = 2, 8, 32, 32
    x = jax.random.normal(kx, (batch, seq, d_in), dtype=jnp.float32)

    # Dense CoLA operator A and bias (zeros, as in __init__).
    A = jax.random.normal(ka, (d_in, d_out), dtype=jnp.float32) / np.sqrt(d_in)
    b = jnp.zeros((d_out,), dtype=jnp.float32)

    # 1) Default CoLALayer config: bias=True, do_rms_norm=False.
    out = jax.block_until_ready(cola_layer_forward(x, A, b, do_rms_norm=False))
    ref = cola_layer_reference(x, A, b, do_rms_norm=False)
    np.testing.assert_allclose(np.asarray(out), np.asarray(ref),
                               rtol=1e-5, atol=1e-5)

    # 2) do_rms_norm=True path (scale x so some rows' rms exceeds 1 and the
    #    clamp actually fires).  Looser tolerance: kernel uses EUP rsqrt+mul,
    #    reference uses sqrt+div.
    xb = 4.0 * x
    out_n = jax.block_until_ready(cola_layer_forward(xb, A, b, do_rms_norm=True))
    ref_n = cola_layer_reference(xb, A, b, do_rms_norm=True)
    np.testing.assert_allclose(np.asarray(out_n), np.asarray(ref_n),
                               rtol=2e-3, atol=2e-3)

    # 3) Ragged-M path (no pre-pad copy) and no-bias config: M=40 rows with a
    #    16-row tile -> final block is partially out of bounds and masked.
    x3 = jax.random.normal(kx2, (5, 8, d_in), dtype=jnp.float32)
    out_r = jax.block_until_ready(
        cola_layer_forward(x3, A, None, do_rms_norm=False, tile_m=16))
    ref_r = cola_layer_reference(x3, A, None, do_rms_norm=False)
    np.testing.assert_allclose(np.asarray(out_r), np.asarray(ref_r),
                               rtol=1e-5, atol=1e-5)

    # TODO(synk): padding, track_spectral_norm (power-iteration bookkeeping)
    # and eval-time update_info diagnostics are training utilities and are not
    # implemented in the kernel.
    print("KERNEL_OK")
</pallas_src>

<mosaic_0001>
module attributes {stable_mosaic.version = 11 : i64} {
  func.func @_cola_kernel(%arg0: i32, %arg1: i32, %arg2: i32, %arg3: memref<16x32xf32, #tpu.memory_space<vmem>>, %arg4: memref<32x32xf32, #tpu.memory_space<vmem>>, %arg5: memref<1x32xf32, #tpu.memory_space<vmem>>, %arg6: memref<16x32xf32, #tpu.memory_space<vmem>>, %arg7: memref<16x32xf32, #tpu.memory_space<vmem>>) attributes {dimension_semantics = [#tpu.dimension_semantics<parallel>, #tpu.dimension_semantics<parallel>, #tpu.dimension_semantics<arbitrary>], iteration_bounds = array<i64: 1, 1, 1>, scalar_prefetch = 0 : i64, scratch_operands = 1 : i64, tpu.core_type = #tpu.core_type<tc>, window_params = [{transform_indices = @transform_0, window_bounds = array<i64: 16, 32>}, {transform_indices = @transform_1, window_bounds = array<i64: 32, 32>}, {transform_indices = @transform_2, window_bounds = array<i64: 1, 32>}, {transform_indices = @transform_3, window_bounds = array<i64: 16, 32>}]} {
    %c0_i32 = arith.constant 0 : i32
    %0 = arith.cmpi eq, %arg2, %c0_i32 : i32
    %1 = arith.extui %0 : i1 to i32
    %c0_i32_0 = arith.constant 0 : i32
    %2 = arith.cmpi ne, %1, %c0_i32_0 : i32
    scf.if %2 {
      %cst_10 = arith.constant 0.000000e+00 : f32
      %12 = vector.broadcast %cst_10 : f32 to vector<16x32xf32>
      %c0_11 = arith.constant 0 : index
      %c0_12 = arith.constant 0 : index
      %13 = vector.load %arg7[%c0_11, %c0_12] : memref<16x32xf32, #tpu.memory_space<vmem>>, vector<16x32xf32>
      tpu.vector_store %arg7[%c0_11, %c0_12], %12 {strides = array<i32>} : memref<16x32xf32, #tpu.memory_space<vmem>>, vector<16x32xf32>,
    } else {
    }
    %c0 = arith.constant 0 : index
    %c0_1 = arith.constant 0 : index
    %3 = vector.load %arg7[%c0, %c0_1] : memref<16x32xf32, #tpu.memory_space<vmem>>, vector<16x32xf32>
    %c0_2 = arith.constant 0 : index
    %c0_3 = arith.constant 0 : index
    %4 = vector.load %arg3[%c0_2, %c0_3] : memref<16x32xf32, #tpu.memory_space<vmem>>, vector<16x32xf32>
    %c0_4 = arith.constant 0 : index
    %c0_5 = arith.constant 0 : index
    %5 = vector.load %arg4[%c0_4, %c0_5] : memref<32x32xf32, #tpu.memory_space<vmem>>, vector<32x32xf32>
    %cst = arith.constant dense<0.000000e+00> : vector<16x32xf32>
    %6 = tpu.matmul %4, %5, %cst {dimension_numbers = #tpu.dot_dimension_numbers<[1], [0], [0], [1], [0, 0, 1, 1], [], []>} : vector<16x32xf32>, vector<32x32xf32>, vector<16x32xf32> -> vector<16x32xf32>
    %7 = arith.addf %3, %6 : vector<16x32xf32>
    %c0_6 = arith.constant 0 : index
    %c0_7 = arith.constant 0 : index
    %8 = vector.load %arg7[%c0_6, %c0_7] : memref<16x32xf32, #tpu.memory_space<vmem>>, vector<16x32xf32>
    tpu.vector_store %arg7[%c0_6, %c0_7], %7 {strides = array<i32>} : memref<16x32xf32, #tpu.memory_space<vmem>>, vector<16x32xf32>,
    %c0_i32_8 = arith.constant 0 : i32
    %9 = arith.cmpi eq, %arg2, %c0_i32_8 : i32
    %10 = arith.extui %9 : i1 to i32
    %c0_i32_9 = arith.constant 0 : i32
    %11 = arith.cmpi ne, %10, %c0_i32_9 : i32
    scf.if %11 {
      %c0_10 = arith.constant 0 : index
      %c0_11 = arith.constant 0 : index
      %12 = vector.load %arg7[%c0_10, %c0_11] : memref<16x32xf32, #tpu.memory_space<vmem>>, vector<16x32xf32>
      %c0_12 = arith.constant 0 : index
      %c0_13 = arith.constant 0 : index
      %13 = vector.load %arg5[%c0_12, %c0_13] : memref<1x32xf32, #tpu.memory_space<vmem>>, vector<1x32xf32>
      %14 = vector.broadcast %13 : vector<1x32xf32> to vector<16x32xf32>
      %15 = arith.addf %12, %14 : vector<16x32xf32>
      %c0_14 = arith.constant 0 : index
      %c0_15 = arith.constant 0 : index
      %16 = vector.load %arg6[%c0_14, %c0_15] : memref<16x32xf32, #tpu.memory_space<vmem>>, vector<16x32xf32>
      tpu.vector_store %arg6[%c0_14, %c0_15], %15 {strides = array<i32>} : memref<16x32xf32, #tpu.memory_space<vmem>>, vector<16x32xf32>,
    } else {
    }
    return
  }
  func.func @transform_0(%arg0: i32, %arg1: i32, %arg2: i32) -> (i32, i32) {
    %c0_i32 = arith.constant 0 : i32
    return %arg0, %arg2 : i32, i32
  }
  func.func @transform_1(%arg0: i32, %arg1: i32, %arg2: i32) -> (i32, i32) {
    %c0_i32 = arith.constant 0 : i32
    return %arg2, %arg1 : i32, i32
  }
  func.func @transform_2(%arg0: i32, %arg1: i32, %arg2: i32) -> (i32, i32) {
    %c0_i32 = arith.constant 0 : i32
    %c0_i32_0 = arith.constant 0 : i32
    return %c0_i32, %arg1 : i32, i32
  }
  func.func @transform_3(%arg0: i32, %arg1: i32, %arg2: i32) -> (i32, i32) {
    %c0_i32 = arith.constant 0 : i32
    return %arg0, %arg1 : i32, i32
  }
}

</mosaic_0001>

<bundles_post_ra>
// kernel: tpu_custom_call.1
= control target key start
LH: loop header
LB: loop body
LE: loop exit
PB: predicated region body
PF: predicated region fallthrough
CT: control target
= control target key end

     0   :  { %8 = vsyncpa [#allocation4], 0  ;;  %s325_s0 = inlined_call_operand.hbm [shape: f32[16,32], index: 0, kind: input, shape index: {}]   ;;  %s326_s1 = inlined_call_operand.hbm [shape: f32[32,32], index: 1, kind: input, shape index: {}]   ;;  %s327_s2 = inlined_call_operand.vmem [shape: f32[1,32], index: 2, kind: input, shape index: {}]   ;;  %s328_s3 = inlined_call_operand.hbm [shape: f32[16,32], index: 3, kind: output, shape index: {}]  }
   0x1   :  { %9 = vsyncpa [#allocation7], 0 }
   0x2   :  { %10 = vsyncpa [#allocation5], 0  ;;  %s270_s12 = smov [#allocation3]  }
   0x3   :  { %s16_s13 = sshll.u32 %s270_s12, 4  ;;  %s17_s13 = int_to_ptr.vmem [resolvable:$true] %s16_s13 }
   0x4   :  { %s212_s14 = scalar_lea.vmem %s17_s13, 256  ;;  %p217_p1 = scmp.lt.s32.totalorder %s17_s13, %s17_s13 }
   0x5   :  { %p213_p0 = scmp.ne.s32.totalorder %s17_s13, %s212_s14  ;;  %p218_p2 = scmp.lt.s32.totalorder %s212_s14, %s212_s14 }
   0x7   :  { %p219_p3 = por %p218_p2, %p217_p1 }
   0x9   :  { %p220_p4 = pnand %p219_p3, %p213_p0 }
   0xb   :  { %223 = shalt.err (!%p220_p4)
}
   0xc   :  { %s271_s15 = smov 128   ;;  %s272_s16 = smov 8  }
   0xd   :  { %22 = dma.hbm_to_vmem [thread:$0]  %s325_s0, 256, %s17_s13, [#allocation4], %s271_s15, %s271_s15, %s272_s16  }
   0xe   :  { %s273_s19 = smov [#allocation6]  }
   0xf   :  { %s28_s20 = sshll.u32 %s273_s19, 4  ;;  %s29_s20 = int_to_ptr.vmem [resolvable:$true] %s28_s20 }
  0x10   :  { %s232_s21 = scalar_lea.vmem %s29_s20, 512  ;;  %p237_p6 = scmp.lt.s32.totalorder %s29_s20, %s29_s20 }
  0x11   :  { %p233_p5 = scmp.ne.s32.totalorder %s29_s20, %s232_s21  ;;  %p238_p7 = scmp.lt.s32.totalorder %s232_s21, %s232_s21 }
  0x13   :  { %p239_p8 = por %p238_p7, %p237_p6 }
  0x15   :  { %p240_p9 = pnand %p239_p8, %p233_p5 }
  0x17   :  { %243 = shalt.err (!%p240_p9)
}
  0x18   :  { %34 = dma.hbm_to_vmem [thread:$0]  %s326_s1, 512, %s29_s20, [#allocation7], %s271_s15, %s271_s15, %s272_s16  }
  0x19   :  { %264 = dma.done.wait [#allocation4], 256  }
  0x1a   :  { %265 = vsyncadd [#allocation4], 4294967040 }
  0x1b   :  { %266 = dma.done.wait [#allocation7], 512  }
  0x1c   :  { %267 = vsyncadd [#allocation7], 4294966784  ;;  %vm47_vm0 = vcmask 261120   ;;  %v274_v0 = vmov 0.0   ;;  %v57_v1 = vld [vmem:[#allocation6 + $0x18] sm:$0xff]  ;;  %v56_v2 = vld [vmem:[#allocation6 + $0x10] sm:$0xff] }
  0x1d   :  { %49 = vst.msk [vmem:[#allocation2 + $0x8] sm:$0xff] %vm47_vm0, %v274_v0  ;;  %48 = vst.msk [vmem:[#allocation2] sm:$0xff] %vm47_vm0, %v274_v0  ;;  %187 = vmatprep.subr.mxu0 %v57_v1  ;;  %v52_v3 = vld [vmem:[#allocation3] sm:$0xff]  ;;  %v55_v4 = vld [vmem:[#allocation6 + $0x8] sm:$0xff]  ;;  %s275_s24 = smov [#allocation8]  }
  0x1e   :  { %188 = vmatpush3.msra.mxu0 %v57_v1  ;;  %195 = vmatprep.mubr.msk.f32.mxu0 %vm47_vm0, %v52_v3  ;;  %v54_v5 = vld [vmem:[#allocation6] sm:$0xff]  ;;  %v53_v6 = vld [vmem:[#allocation3 + $0x8] sm:$0xff]  ;;  %s165_s25 = sshll.u32 %s275_s24, 4  ;;  %s166_s25 = int_to_ptr.vmem [resolvable:$true] %s165_s25 }
  0x1f   :  { %189 = vmatprep.subr.mxu0 %v56_v2  ;;  %v180_v13 = vld [vmem:[%s327_s2] ss:$0 sm:$0xff]  ;;  %s244_s26 = scalar_lea.vmem %s166_s25, 256  ;;  %p249_p11 = scmp.lt.s32.totalorder %s166_s25, %s166_s25 }
  0x20   :  { %190 = vmatpush3.msra.mxu0 %v56_v2  ;;  %p245_p10 = scmp.ne.s32.totalorder %s166_s25, %s244_s26  ;;  %p250_p12 = scmp.lt.s32.totalorder %s244_s26, %s244_s26 }
  0x21   :  { %191 = vmatprep.subr.mxu0 %v55_v4 }
  0x22   :  { %192 = vmatpush3.msra.mxu0 %v55_v4  ;;  %p251_p13 = por %p250_p12, %p249_p11 }
  0x23   :  { %193 = vmatprep.subr.mxu0 %v54_v5 }
  0x24   :  { %194 = vmatpush3.msra.mxu0 %v54_v5  ;;  %v51_v7 = vld [vmem:[#allocation2 + $0x8] sm:$0xff]  ;;  %v50_v9 = vld [vmem:[#allocation2] sm:$0xff]  ;;  %p252_p0 = pnand %p251_p13, %p245_p10 }
  0x25   :  { %196 = vmatmul.mubr.msk.f32.vlgmr.msra.gmra.mxu0 %vm47_vm0, %v53_v6 }
  0xe5   :  { %v197_v8 = vpop.f32.mrf.mxu0 }
  0xe6   :  { %v141_v10 = vadd.f32 %v197_v8, %v51_v7 }
  0xe7   :  { %v131_v11 = vpop.f32.mrf.mxu0 }
  0xe8   :  { %143 = vst.msk [vmem:[#allocation2 + $0x8] sm:$0xff] %vm47_vm0, %v141_v10  ;;  %v140_v12 = vadd.f32 %v131_v11, %v50_v9 }
  0xea   :  { %142 = vst.msk [vmem:[#allocation2] sm:$0xff] %vm47_vm0, %v140_v12 }
  0xef   :  { %v148_v14 = vld [vmem:[#allocation2 + $0x8] sm:$0xff] }
  0xf0   :  { %v157_v15 = vadd.f32 %v180_v13, %v148_v14 }
  0xf1   :  { %v147_v16 = vld [vmem:[#allocation2] sm:$0xff] }
  0xf2   :  { %v156_v17 = vadd.f32 %v180_v13, %v147_v16  ;;  %159 = vst.msk [vmem:[#allocation8 + $0x8] sm:$0xff] %vm47_vm0, %v157_v15 }
  0xf4   :  { %158 = vst.msk [vmem:[#allocation8] sm:$0xff] %vm47_vm0, %v156_v17 }
  0xf5   :  { %255 = shalt.err (!%p252_p0)
}
  0xf6   :  { %171 = dma.vmem_to_hbm [thread:$0]  %s166_s25, 256, %s328_s3, [#allocation5], %s271_s15, %s271_s15, %s272_s16  }
  0xf7   :  { %268 = dma.done.wait [#allocation5], 256  }
  0xf8   :  { %269 = vsyncadd [#allocation5], 4294967040 }
  0xf9   :  { %175 = vsyncpa [#allocation4], 1 }
  0xfa   :  { %176 = vsyncpa [#allocation7], 1 }
  0xfb   :  { %177 = vsyncpa [#allocation5], 1 }

</bundles_post_ra>
